<compile_context>
chip_gen: v6e
topology: v6e:2x2x1
jax: 0.10.0
libtpu: 0.0.40
codegen_flags: <defaults>
</compile_context>

<pallas_src>
import jax
import jax.numpy as jnp
from jax.experimental import pallas as pl
from jax.experimental.pallas import tpu as pltpu

BIG = 1.0e12  # same constant as the PyTorch reference (1000000000000.0)


def _round_up(x, m):
    return (x + m - 1) // m * m


def _gp_ce_kernel(y_true_ref, y_pred_ref, loss_ref, m_ref, s_neg_ref, s_pos_ref):
    """Streaming multilabel categorical crossentropy.

    y_true_ref / y_pred_ref : (RB, DK) tiles of the (bh_pad, d_pad) views.
    loss_ref                : (RB, 128) per-row loss, broadcast across lanes.
    m_ref, s_neg_ref, s_pos_ref : (RB, 1) f32 online-logsumexp state.
    """
    k = pl.program_id(1)

    @pl.when(k == 0)
    def _init():
        # The appended zero column: running max starts at 0 and each running
        # sum starts at exp(0 - 0) = 1.
        m_ref[...] = jnp.zeros_like(m_ref)
        s_neg_ref[...] = jnp.ones_like(s_neg_ref)
        s_pos_ref[...] = jnp.ones_like(s_pos_ref)

    yt = y_true_ref[...].astype(jnp.float32)                     # 0/1 mask
    z = (1.0 - 2.0 * yt) * y_pred_ref[...].astype(jnp.float32)   # flipped logits

    # Shared-max online logsumexp: ONE exp pass over the tile feeds both the
    # positive and negative branches (select via yt / (1-yt) multiplies).
    m_prev = m_ref[...]
    m_new = jnp.maximum(m_prev, jnp.max(z, axis=-1, keepdims=True))
    rescale = jnp.exp(m_prev - m_new)
    e = jnp.exp(z - m_new)                                       # (RB, DK) single EUP pass
    s_neg_ref[...] = s_neg_ref[...] * rescale + jnp.sum((1.0 - yt) * e, axis=-1, keepdims=True)
    s_pos_ref[...] = s_pos_ref[...] * rescale + jnp.sum(yt * e, axis=-1, keepdims=True)
    m_ref[...] = m_new

    @pl.when(k == pl.num_programs(1) - 1)
    def _finalize():
        tiny = jnp.float32(1e-30)  # guard log(0) if one branch underflows (|gap| > ~87)
        loss = (2.0 * m_ref[...]
                + jnp.log(jnp.maximum(s_neg_ref[...], tiny))
                + jnp.log(jnp.maximum(s_pos_ref[...], tiny)))    # (RB, 1)
        # Lane-dense (unmasked) store: broadcast the per-row loss across 128 lanes.
        loss_ref[...] = jnp.broadcast_to(loss, loss_ref.shape)


def _select_tiling(bh, d, vmem_cap):
    """Pick (row_block, bh_pad, d_chunk, d_pad) from the VMEM capacity."""
    d_pad = _round_up(d, 128)
    # Streamed-input budget: double-buffered f32 logits (4B) + bf16 target (2B).
    budget = int(0.4 * vmem_cap)
    max_elems = max(budget // 12, 8 * 128)   # row_block * d_chunk element budget

    if bh <= 8:
        rb = 8
        bh_pad = 8
    else:
        rb = min(bh, 256, max(16, max_elems // 128))
        rb = max(16, rb - rb % 16)           # multiple of 16: f32 & bf16 sublane packing
        if pl.cdiv(bh, rb) < 2:              # >=2 row steps -> both v7x TensorCores busy
            half = (rb // 2) - (rb // 2) % 16
            rb = max(16, half)
        num_i = pl.cdiv(bh, rb)
        rb = _round_up(pl.cdiv(bh, num_i), 16)   # rebalance -> minimal row padding
        bh_pad = num_i * rb

    # D chunk: fill the remaining element budget, multiple of 128 lanes.
    dk = min(d_pad, max(128, (max_elems // rb) // 128 * 128))
    num_k = pl.cdiv(d_pad, dk)
    dk = _round_up(pl.cdiv(d_pad, num_k), 128)   # rebalance -> minimal column padding
    d_pad = num_k * dk
    return rb, bh_pad, dk, d_pad


def global_pointer_cross_entropy(logits, target):
    """logits, target: [N, C, L, L]  ->  scalar mean loss (float32)."""
    n, c, l1, l2 = logits.shape
    bh = n * c
    d = l1 * l2

    logits2 = jnp.reshape(logits, (bh, d))
    if logits2.dtype not in (jnp.dtype(jnp.float32), jnp.dtype(jnp.bfloat16)):
        logits2 = logits2.astype(jnp.float32)
    # target is a 0/1 mask: bf16 is exact and halves its HBM read traffic vs f32.
    target2 = jnp.reshape(target, (bh, d)).astype(jnp.bfloat16)

    try:
        vmem_cap = int(pltpu.get_tpu_info().vmem_capacity_bytes)
    except Exception:
        vmem_cap = 64 << 20   # conservative (v7x-sized) fallback

    rb, bh_pad, dk, d_pad = _select_tiling(bh, d, vmem_cap)

    if d_pad != d:
        # Padded columns carry -BIG logits / 0 targets -> exactly 0 contribution.
        logits2 = jnp.pad(logits2, ((0, 0), (0, d_pad - d)), constant_values=-BIG)
        target2 = jnp.pad(target2, ((0, 0), (0, d_pad - d)))
    if bh_pad != bh:
        # Padded rows are computed but sliced off before the mean.
        logits2 = jnp.pad(logits2, ((0, bh_pad - bh), (0, 0)))
        target2 = jnp.pad(target2, ((0, bh_pad - bh), (0, 0)))

    # Raise the scoped-VMEM limit so the large double-buffered tiles fit
    # (generation-aware: capped at 75% of physical VMEM).
    in_bytes = 2 * rb * dk * (logits2.dtype.itemsize + target2.dtype.itemsize)
    aux_bytes = 5 * rb * 128 * 4          # output block + 3 scratch vectors (padded)
    need = in_bytes + aux_bytes + (1 << 20)
    vmem_limit = int(min(0.75 * vmem_cap, max(2 * need, 64 << 20)))

    grid = (bh_pad // rb, d_pad // dk)

    per_row = pl.pallas_call(
        _gp_ce_kernel,
        out_shape=jax.ShapeDtypeStruct((bh_pad, 128), jnp.float32),
        grid_spec=pltpu.PrefetchScalarGridSpec(
            num_scalar_prefetch=0,
            grid=grid,
            in_specs=[
                pl.BlockSpec((rb, dk), lambda i, k: (i, k)),   # y_true (bf16)
                pl.BlockSpec((rb, dk), lambda i, k: (i, k)),   # y_pred (logits)
            ],
            out_specs=pl.BlockSpec((rb, 128), lambda i, k: (i, 0)),
            scratch_shapes=[
                pltpu.VMEM((rb, 1), jnp.float32),   # running max  m
                pltpu.VMEM((rb, 1), jnp.float32),   # running sum  (neg branch)
                pltpu.VMEM((rb, 1), jnp.float32),   # running sum  (pos branch)
            ],
        ),
        compiler_params=pltpu.CompilerParams(
            dimension_semantics=("parallel", "arbitrary"),
            vmem_limit_bytes=vmem_limit,
        ),
    )(target2, logits2)

    # torch.mean over the bh rows (cheap glue, done in plain JAX).
    return jnp.mean(per_row[:bh, 0])


def _reference(logits, target):
    """Pure-JAX reference mirroring the PyTorch code (for a silent sanity check)."""
    bh = logits.shape[0] * logits.shape[1]
    y_pred = jnp.reshape(logits, (bh, -1)).astype(jnp.float32)
    y_true = jnp.reshape(target, (bh, -1)).astype(jnp.float32)
    y_pred = (1.0 - 2.0 * y_true) * y_pred
    y_pred_neg = y_pred - y_true * BIG
    y_pred_pos = y_pred - (1.0 - y_true) * BIG
    zeros = jnp.zeros_like(y_pred[..., :1])
    y_pred_neg = jnp.concatenate([y_pred_neg, zeros], axis=-1)
    y_pred_pos = jnp.concatenate([y_pred_pos, zeros], axis=-1)
    neg_loss = jax.scipy.special.logsumexp(y_pred_neg, axis=-1)
    pos_loss = jax.scipy.special.logsumexp(y_pred_pos, axis=-1)
    return jnp.mean(neg_loss + pos_loss)


if __name__ == "__main__":
    key = jax.random.PRNGKey(0)
    k1, k2, k3, k4 = jax.random.split(key, 4)

    # Case 1: logits [N=2, C=4, L=16, L=16]  (L*L already a multiple of 128)
    logits_a = jax.random.normal(k1, (2, 4, 16, 16), dtype=jnp.float32) * 3.0
    target_a = (jax.random.uniform(k2, (2, 4, 16, 16)) < 0.05).astype(jnp.float32)
    loss_a = jax.block_until_ready(global_pointer_cross_entropy(logits_a, target_a))
    ref_a = jax.block_until_ready(_reference(logits_a, target_a))
    assert jnp.allclose(loss_a, ref_a, rtol=2e-4, atol=2e-4), (loss_a, ref_a)

    # Case 2: L*L NOT a multiple of 128 (exercises the -BIG column-padding path)
    logits_b = jax.random.normal(k3, (2, 4, 10, 10), dtype=jnp.float32) * 3.0
    target_b = (jax.random.uniform(k4, (2, 4, 10, 10)) < 0.05).astype(jnp.float32)
    loss_b = jax.block_until_ready(global_pointer_cross_entropy(logits_b, target_b))
    ref_b = jax.block_until_ready(_reference(logits_b, target_b))
    assert jnp.allclose(loss_b, ref_b, rtol=2e-4, atol=2e-4), (loss_b, ref_b)

    print("KERNEL_OK")
</pallas_src>

<mosaic_0001>
module attributes {stable_mosaic.version = 11 : i64} {
  func.func @_gp_ce_kernel(%arg0: i32, %arg1: i32, %arg2: memref<8x256xbf16, #tpu.memory_space<vmem>>, %arg3: memref<8x256xf32, #tpu.memory_space<vmem>>, %arg4: memref<8x128xf32, #tpu.memory_space<vmem>>, %arg5: memref<8x1xf32, #tpu.memory_space<vmem>>, %arg6: memref<8x1xf32, #tpu.memory_space<vmem>>, %arg7: memref<8x1xf32, #tpu.memory_space<vmem>>) attributes {dimension_semantics = [#tpu.dimension_semantics<parallel>, #tpu.dimension_semantics<arbitrary>], iteration_bounds = array<i64: 1, 1>, scalar_prefetch = 0 : i64, scratch_operands = 3 : i64, tpu.core_type = #tpu.core_type<tc>, window_params = [{transform_indices = @transform_0, window_bounds = array<i64: 8, 256>}, {transform_indices = @transform_1, window_bounds = array<i64: 8, 256>}, {transform_indices = @transform_2, window_bounds = array<i64: 8, 128>}]} {
    %c0_i32 = arith.constant 0 : i32
    %0 = arith.cmpi eq, %arg1, %c0_i32 : i32
    %1 = arith.extui %0 : i1 to i32
    %c0_i32_0 = arith.constant 0 : i32
    %2 = arith.cmpi ne, %1, %c0_i32_0 : i32
    scf.if %2 {
      %cst_23 = arith.constant 0.000000e+00 : f32
      %40 = vector.broadcast %cst_23 : f32 to vector<8x1xf32>
      %c0_24 = arith.constant 0 : index
      %c0_25 = arith.constant 0 : index
      %41 = vector.load %arg5[%c0_24, %c0_25] : memref<8x1xf32, #tpu.memory_space<vmem>>, vector<8x1xf32>
      tpu.vector_store %arg5[%c0_24, %c0_25], %40 {strides = array<i32>} : memref<8x1xf32, #tpu.memory_space<vmem>>, vector<8x1xf32>,
      %cst_26 = arith.constant 1.000000e+00 : f32
      %42 = vector.broadcast %cst_26 : f32 to vector<8x1xf32>
      %c0_27 = arith.constant 0 : index
      %c0_28 = arith.constant 0 : index
      %43 = vector.load %arg6[%c0_27, %c0_28] : memref<8x1xf32, #tpu.memory_space<vmem>>, vector<8x1xf32>
      tpu.vector_store %arg6[%c0_27, %c0_28], %42 {strides = array<i32>} : memref<8x1xf32, #tpu.memory_space<vmem>>, vector<8x1xf32>,
      %cst_29 = arith.constant 1.000000e+00 : f32
      %44 = vector.broadcast %cst_29 : f32 to vector<8x1xf32>
      %c0_30 = arith.constant 0 : index
      %c0_31 = arith.constant 0 : index
      %45 = vector.load %arg7[%c0_30, %c0_31] : memref<8x1xf32, #tpu.memory_space<vmem>>, vector<8x1xf32>
      tpu.vector_store %arg7[%c0_30, %c0_31], %44 {strides = array<i32>} : memref<8x1xf32, #tpu.memory_space<vmem>>, vector<8x1xf32>,
    } else {
    }
    %c0 = arith.constant 0 : index
    %c0_1 = arith.constant 0 : index
    %3 = vector.load %arg2[%c0, %c0_1] : memref<8x256xbf16, #tpu.memory_space<vmem>>, vector<8x256xbf16>
    %4 = arith.extf %3 : vector<8x256xbf16> to vector<8x256xf32>
    %cst = arith.constant 2.000000e+00 : f32
    %5 = vector.broadcast %cst : f32 to vector<8x256xf32>
    %6 = arith.mulf %5, %4 : vector<8x256xf32>
    %cst_2 = arith.constant 1.000000e+00 : f32
    %7 = vector.broadcast %cst_2 : f32 to vector<8x256xf32>
    %8 = arith.subf %7, %6 : vector<8x256xf32>
    %c0_3 = arith.constant 0 : index
    %c0_4 = arith.constant 0 : index
    %9 = vector.load %arg3[%c0_3, %c0_4] : memref<8x256xf32, #tpu.memory_space<vmem>>, vector<8x256xf32>
    %10 = arith.mulf %8, %9 : vector<8x256xf32>
    %c0_5 = arith.constant 0 : index
    %c0_6 = arith.constant 0 : index
    %11 = vector.load %arg5[%c0_5, %c0_6] : memref<8x1xf32, #tpu.memory_space<vmem>>, vector<8x1xf32>
    %cst_7 = arith.constant dense<0xFF800000> : vector<8xf32>
    %12 = vector.multi_reduction <maximumf>, %10, %cst_7 [1] : vector<8x256xf32> to vector<8xf32>
    %13 = vector.shape_cast %12 : vector<8xf32> to vector<8x1xf32>
    %14 = arith.maximumf %11, %13 : vector<8x1xf32>
    %15 = arith.subf %11, %14 : vector<8x1xf32>
    %16 = math.exp %15 : vector<8x1xf32>
    %17 = vector.broadcast %14 : vector<8x1xf32> to vector<8x256xf32>
    %18 = arith.subf %10, %17 : vector<8x256xf32>
    %19 = math.exp %18 : vector<8x256xf32>
    %c0_8 = arith.constant 0 : index
    %c0_9 = arith.constant 0 : index
    %20 = vector.load %arg6[%c0_8, %c0_9] : memref<8x1xf32, #tpu.memory_space<vmem>>, vector<8x1xf32>
    %21 = arith.mulf %20, %16 : vector<8x1xf32>
    %cst_10 = arith.constant 1.000000e+00 : f32
    %22 = vector.broadcast %cst_10 : f32 to vector<8x256xf32>
    %23 = arith.subf %22, %4 : vector<8x256xf32>
    %24 = arith.mulf %23, %19 : vector<8x256xf32>
    %cst_11 = arith.constant dense<0.000000e+00> : vector<8xf32>
    %25 = vector.multi_reduction <add>, %24, %cst_11 [1] : vector<8x256xf32> to vector<8xf32>
    %26 = vector.shape_cast %25 : vector<8xf32> to vector<8x1xf32>
    %27 = arith.addf %21, %26 : vector<8x1xf32>
    %c0_12 = arith.constant 0 : index
    %c0_13 = arith.constant 0 : index
    %28 = vector.load %arg6[%c0_12, %c0_13] : memref<8x1xf32, #tpu.memory_space<vmem>>, vector<8x1xf32>
    tpu.vector_store %arg6[%c0_12, %c0_13], %27 {strides = array<i32>} : memref<8x1xf32, #tpu.memory_space<vmem>>, vector<8x1xf32>,
    %c0_14 = arith.constant 0 : index
    %c0_15 = arith.constant 0 : index
    %29 = vector.load %arg7[%c0_14, %c0_15] : memref<8x1xf32, #tpu.memory_space<vmem>>, vector<8x1xf32>
    %30 = arith.mulf %29, %16 : vector<8x1xf32>
    %31 = arith.mulf %4, %19 : vector<8x256xf32>
    %cst_16 = arith.constant dense<0.000000e+00> : vector<8xf32>
    %32 = vector.multi_reduction <add>, %31, %cst_16 [1] : vector<8x256xf32> to vector<8xf32>
    %33 = vector.shape_cast %32 : vector<8xf32> to vector<8x1xf32>
    %34 = arith.addf %30, %33 : vector<8x1xf32>
    %c0_17 = arith.constant 0 : index
    %c0_18 = arith.constant 0 : index
    %35 = vector.load %arg7[%c0_17, %c0_18] : memref<8x1xf32, #tpu.memory_space<vmem>>, vector<8x1xf32>
    tpu.vector_store %arg7[%c0_17, %c0_18], %34 {strides = array<i32>} : memref<8x1xf32, #tpu.memory_space<vmem>>, vector<8x1xf32>,
    %c0_19 = arith.constant 0 : index
    %c0_20 = arith.constant 0 : index
    %36 = vector.load %arg5[%c0_19, %c0_20] : memref<8x1xf32, #tpu.memory_space<vmem>>, vector<8x1xf32>
    tpu.vector_store %arg5[%c0_19, %c0_20], %14 {strides = array<i32>} : memref<8x1xf32, #tpu.memory_space<vmem>>, vector<8x1xf32>,
    %c0_i32_21 = arith.constant 0 : i32
    %37 = arith.cmpi eq, %arg1, %c0_i32_21 : i32
    %38 = arith.extui %37 : i1 to i32
    %c0_i32_22 = arith.constant 0 : i32
    %39 = arith.cmpi ne, %38, %c0_i32_22 : i32
    scf.if %39 {
      %c0_23 = arith.constant 0 : index
      %c0_24 = arith.constant 0 : index
      %40 = vector.load %arg5[%c0_23, %c0_24] : memref<8x1xf32, #tpu.memory_space<vmem>>, vector<8x1xf32>
      %cst_25 = arith.constant 2.000000e+00 : f32
      %41 = vector.broadcast %cst_25 : f32 to vector<8x1xf32>
      %42 = arith.mulf %41, %40 : vector<8x1xf32>
      %c0_26 = arith.constant 0 : index
      %c0_27 = arith.constant 0 : index
      %43 = vector.load %arg6[%c0_26, %c0_27] : memref<8x1xf32, #tpu.memory_space<vmem>>, vector<8x1xf32>
      %cst_28 = arith.constant 1.000000e-30 : f32
      %44 = vector.broadcast %cst_28 : f32 to vector<8x1xf32>
      %45 = arith.maximumf %43, %44 : vector<8x1xf32>
      %46 = math.log %45 : vector<8x1xf32>
      %47 = arith.addf %42, %46 : vector<8x1xf32>
      %c0_29 = arith.constant 0 : index
      %c0_30 = arith.constant 0 : index
      %48 = vector.load %arg7[%c0_29, %c0_30] : memref<8x1xf32, #tpu.memory_space<vmem>>, vector<8x1xf32>
      %cst_31 = arith.constant 1.000000e-30 : f32
      %49 = vector.broadcast %cst_31 : f32 to vector<8x1xf32>
      %50 = arith.maximumf %48, %49 : vector<8x1xf32>
      %51 = math.log %50 : vector<8x1xf32>
      %52 = arith.addf %47, %51 : vector<8x1xf32>
      %53 = vector.shape_cast %52 : vector<8x1xf32> to vector<8x1xf32>
      %54 = vector.broadcast %53 : vector<8x1xf32> to vector<8x128xf32>
      %c0_32 = arith.constant 0 : index
      %c0_33 = arith.constant 0 : index
      %55 = vector.load %arg4[%c0_32, %c0_33] : memref<8x128xf32, #tpu.memory_space<vmem>>, vector<8x128xf32>
      tpu.vector_store %arg4[%c0_32, %c0_33], %54 {strides = array<i32>} : memref<8x128xf32, #tpu.memory_space<vmem>>, vector<8x128xf32>,
    } else {
    }
    return
  }
  func.func @transform_0(%arg0: i32, %arg1: i32) -> (i32, i32) {
    %c0_i32 = arith.constant 0 : i32
    return %arg0, %arg1 : i32, i32
  }
  func.func @transform_1(%arg0: i32, %arg1: i32) -> (i32, i32) {
    %c0_i32 = arith.constant 0 : i32
    return %arg0, %arg1 : i32, i32
  }
  func.func @transform_2(%arg0: i32, %arg1: i32) -> (i32, i32) {
    %c0_i32 = arith.constant 0 : i32
    %c0_i32_0 = arith.constant 0 : i32
    return %arg0, %c0_i32 : i32, i32
  }
}

</mosaic_0001>

<bundles_post_ra>
// kernel: tpu_custom_call.1
= control target key start
LH: loop header
LB: loop body
LE: loop exit
PB: predicated region body
PF: predicated region fallthrough
CT: control target
= control target key end

     0   :  { %7 = vsyncpa [#allocation6], 0  ;;  %s253_s0 = inlined_call_operand.hbm [shape: bf16[8,256], index: 0, kind: input, shape index: {}]   ;;  %s254_s1 = inlined_call_operand.hbm [shape: f32[8,256], index: 1, kind: input, shape index: {}]   ;;  %s255_s2 = inlined_call_operand.hbm [shape: f32[8,128], index: 2, kind: output, shape index: {}]  }
   0x1   :  { %8 = vsyncpa [#allocation9], 0 }
   0x2   :  { %9 = vsyncpa [#allocation7], 0  ;;  %s217_s9 = smov [#allocation5]   ;;  %s218_s11 = smov [#allocation8]  }
   0x3   :  { %s16_s10 = sshll.u32 %s217_s9, 4  ;;  %s26_s12 = sshll.u32 %s218_s11, 4  ;;  %s17_s10 = int_to_ptr.vmem [resolvable:$true] %s16_s10  ;;  %s27_s12 = int_to_ptr.vmem [resolvable:$true] %s26_s12 }
   0x4   :  { %s159_s13 = scalar_lea.vmem %s17_s10, 128  ;;  %p164_p1 = scmp.lt.s32.totalorder %s17_s10, %s17_s10 }
   0x5   :  { %p160_p0 = scmp.ne.s32.totalorder %s17_s10, %s159_s13  ;;  %p165_p2 = scmp.lt.s32.totalorder %s159_s13, %s159_s13 }
   0x7   :  { %p166_p3 = por %p165_p2, %p164_p1 }
   0x9   :  { %p167_p4 = pnand %p166_p3, %p160_p0 }
   0xb   :  { %170 = shalt.err (!%p167_p4)
}
   0xc   :  { %19 = dma.hbm_to_vmem [thread:$0]  %s253_s0, 128, %s17_s10, [#allocation6]  }
   0xd   :  { %s179_s16 = scalar_lea.vmem %s27_s12, 256  ;;  %p184_p6 = scmp.lt.s32.totalorder %s27_s12, %s27_s12 }
   0xe   :  { %p180_p5 = scmp.ne.s32.totalorder %s27_s12, %s179_s16  ;;  %p185_p7 = scmp.lt.s32.totalorder %s179_s16, %s179_s16 }
  0x10   :  { %p186_p8 = por %p185_p7, %p184_p6 }
  0x12   :  { %p187_p9 = pnand %p186_p8, %p180_p5 }
  0x14   :  { %190 = shalt.err (!%p187_p9)
}
  0x15   :  { %29 = dma.hbm_to_vmem [thread:$0]  %s254_s1, 256, %s27_s12, [#allocation9]  }
  0x16   :  { %211 = dma.done.wait [#allocation6], 128  }
  0x17   :  { %212 = vsyncadd [#allocation6], 4294967168 }
  0x18   :  { %213 = dma.done.wait [#allocation9], 256  }
  0x19   :  { %214 = vsyncadd [#allocation9], 4294967040  ;;  %vm40_vm0 = vcmask 7168   ;;  %v219_v0 = vmov 0.0   ;;  %v44_v1 = vld [vmem:[#allocation5] sm:$0xff]  ;;  %v51_v6 = vld [vmem:[#allocation8] sm:$0xff] }
  0x1a   :  { %41 = vst.msk [vmem:[#allocation2] sm:$0xff] %vm40_vm0, %v219_v0  ;;  %v45_v2 = vunpack.c.l.bf16 %v44_v1  ;;  %v46_v3 = vunpack.c.h.bf16 %v44_v1  ;;  %v52_v7 = vld [vmem:[#allocation8 + $0x8] sm:$0xff]  ;;  %v220_v13 = vmov 0   ;;  %v221_v14 = vmov 1.0   ;;  %s222_s0 = smov [#allocation10]  }
  0x1b   :  { %139 = vset.pattern.permute.xlu0 %v220_v13  ;;  %140 = vset.pattern.permute.xlu1 %v220_v13  ;;  %42 = vst.msk [vmem:[#allocation3] sm:$0xff] %vm40_vm0, %v221_v14  ;;  %43 = vst.msk [vmem:[#allocation4] sm:$0xff] %vm40_vm0, %v221_v14  ;;  %s123_s1 = sshll.u32 %s222_s0, 4  ;;  %s124_s1 = int_to_ptr.vmem [resolvable:$true] %s123_s1 }
  0x1c   :  { %v47_v4 = vmul.f32 2.0, %v45_v2  ;;  %v48_v5 = vmul.f32 2.0, %v46_v3  ;;  %v76_v24 = vsub.f32 1.0, %v45_v2  ;;  %v77_v25 = vsub.f32 1.0, %v46_v3  ;;  %s191_s19 = scalar_lea.vmem %s124_s1, 128  ;;  %p196_p11 = scmp.lt.s32.totalorder %s124_s1, %s124_s1 }
  0x1d   :  { %p192_p10 = scmp.ne.s32.totalorder %s124_s1, %s191_s19  ;;  %p197_p12 = scmp.lt.s32.totalorder %s191_s19, %s191_s19 }
  0x1e   :  { %v49_v8 = vsub.f32 1.0, %v47_v4  ;;  %v50_v9 = vsub.f32 1.0, %v48_v5 }
  0x1f   :  { %p198_p13 = por %p197_p12, %p196_p11 }
  0x20   :  { %v53_v10 = vmul.f32 %v51_v6, %v49_v8  ;;  %v54_v11 = vmul.f32 %v52_v7, %v50_v9 }
  0x21   :  { %v55_v15 = vld [vmem:[#allocation2] sm:$0xff]  ;;  %p199_p0 = pnand %p198_p13, %p192_p10 }
  0x22   :  { %v56_v12 = vmax.f32 %v53_v10, %v54_v11  ;;  %v74_v36 = vld [vmem:[#allocation3] sm:$0xff]  ;;  %v86_v39 = vld [vmem:[#allocation4] sm:$0xff] }
  0x24   :  { %57 = vmax.xlane.f32.xlu0 %v56_v12 }
  0xad   :  { %v58_v16 = vpop.xlane.xlu0 %57 }
  0xae   :  { %v59_v17 = vmax.f32 %v55_v15, %v58_v16 }
  0xb0   :  { %v60_v18 = vsub.f32 %v55_v15, %v59_v17  ;;  %95 = vst.msk [vmem:[#allocation2] sm:$0xff] %vm40_vm0, %v59_v17  ;;  %65 = vperm.xlu0 %139, %v59_v17  }
  0xb2   :  { %v61_v34 = vmul.f32 1.442695, %v60_v18 }
  0xb7   :  { %v99_v49 = vld [vmem:[#allocation2] sm:$0xff] }
  0xb8   :  { %v100_v51 = vmul.f32 2.0, %v99_v49 }
 0x12b   :  { %v66_v19 = vpop.permute.xlu0 %65 }
 0x12c   :  { %v68_v20 = vsub.f32 %v53_v10, %v66_v19  ;;  %v69_v21 = vsub.f32 %v54_v11, %v66_v19 }
 0x12e   :  { %v70_v22 = vmul.f32 1.442695, %v68_v20  ;;  %v72_v23 = vmul.f32 1.442695, %v69_v21 }
 0x130   :  { %141 = vpow2.f32 %v70_v22 }
 0x131   :  { %143 = vpow2.f32 %v72_v23 }
 0x132   :  { %145 = vpow2.f32 %v61_v34 }
 0x13d   :  { %v142_v26 = vpop.eup %141 }
 0x13e   :  { %v144_v27 = vpop.eup %143  ;;  %v78_v28 = vmul.f32 %v142_v26, %v76_v24  ;;  %v88_v31 = vmul.f32 %v142_v26, %v45_v2 }
 0x13f   :  { %v79_v29 = vmul.f32 %v144_v27, %v77_v25  ;;  %v89_v32 = vmul.f32 %v144_v27, %v46_v3  ;;  %v146_v35 = vpop.eup %145 }
 0x140   :  { %v75_v37 = vmul.f32 %v146_v35, %v74_v36  ;;  %v87_v41 = vmul.f32 %v146_v35, %v86_v39 }
 0x141   :  { %v80_v30 = vadd.f32 %v79_v29, %v78_v28  ;;  %v90_v33 = vadd.f32 %v89_v32, %v88_v31 }
 0x143   :  { %81 = vadd.xlane.f32.xlu1 %v80_v30 }
 0x147   :  { %91 = vadd.xlane.f32.xlu1 %v90_v33 }
 0x1cc   :  { %v82_v38 = vpop.xlane.xlu1 %81 }
 0x1cd   :  { %v83_v40 = vadd.f32 %v82_v38, %v75_v37 }
 0x1cf   :  { %85 = vst.msk [vmem:[#allocation3] sm:$0xff] %vm40_vm0, %v83_v40 }
 0x1d0   :  { %v92_v42 = vpop.xlane.xlu1 %91 }
 0x1d1   :  { %v93_v43 = vadd.f32 %v92_v42, %v87_v41 }
 0x1d3   :  { %94 = vst.msk [vmem:[#allocation4] sm:$0xff] %vm40_vm0, %v93_v43 }
 0x1d6   :  { %v101_v44 = vld [vmem:[#allocation3] sm:$0xff] }
 0x1d7   :  { %v102_v45 = vmax.f32 %v101_v44, 1e-30 }
 0x1d9   :  { %147 = vlog2.f32 %v102_v45 }
 0x1da   :  { %v106_v46 = vld [vmem:[#allocation4] sm:$0xff] }
 0x1db   :  { %v107_v47 = vmax.f32 %v106_v46, 1e-30 }
 0x1dd   :  { %149 = vlog2.f32 %v107_v47 }
 0x1e6   :  { %v148_v48 = vpop.eup %147 }
 0x1e7   :  { %v104_v50 = vmul.f32 0.6931472, %v148_v48 }
 0x1e9   :  { %v105_v53 = vadd.f32 %v104_v50, %v100_v51 }
 0x1ea   :  { %v150_v52 = vpop.eup %149 }
 0x1eb   :  { %v109_v54 = vmul.f32 0.6931472, %v150_v52 }
 0x1ed   :  { %v110_v55 = vadd.f32 %v109_v54, %v105_v53 }
 0x1ef   :  { %113 = vperm.xlu1 %140, %v110_v55  }
 0x26a   :  { %v114_v56 = vpop.permute.xlu1 %113 }
 0x26b   :  { %116 = vst [vmem:[#allocation10] sm:$0xff] %v114_v56 }
 0x26c   :  { %202 = shalt.err (!%p199_p0)
}
 0x26d   :  { %126 = dma.vmem_to_hbm [thread:$0]  %s124_s1, 128, %s255_s2, [#allocation7]  }
 0x26e   :  { %215 = dma.done.wait [#allocation7], 128  }
 0x26f   :  { %216 = vsyncadd [#allocation7], 4294967168 }
 0x270   :  { %130 = vsyncpa [#allocation6], 1 }
 0x271   :  { %131 = vsyncpa [#allocation9], 1 }
 0x272   :  { %132 = vsyncpa [#allocation7], 1 }

</bundles_post_ra>
